<compile_context>
chip_gen: v7x
topology: tpu7x:2x2x1
jax: 0.10.0
libtpu: 0.0.40
codegen_flags: <defaults>
</compile_context>

<pallas_src>
import functools

import jax
import jax.numpy as jnp
from jax.experimental import pallas as pl
from jax.experimental.pallas import tpu as pltpu


def _smooth_ce_kernel(pred_ref, tgt_ref, out_ref, *, label_smooth, class_num,
                      g, n_total, tile_rows):
    i = pl.program_id(0)
    c = class_num
    need_sum_x = label_smooth is not None

    x = pred_ref[...].astype(jnp.float32)          # (tile_rows, L), L = c*g or c
    tgt = tgt_ref[...]                             # (tile_rows, g) int32

    if g > 1:
        # class-major packed layout: class k of row-slot r lives in lane k*g + r
        xs = [x[:, k * g:(k + 1) * g] for k in range(c)]   # each (tile_rows, g)
        m = xs[0]
        for k in range(1, c):
            m = jnp.maximum(m, xs[k])
        sumexp = jnp.zeros_like(m)
        picked = jnp.zeros_like(m)
        sum_x = jnp.zeros_like(m) if need_sum_x else None
        for k in range(c):
            sumexp = sumexp + jnp.exp(xs[k] - m)
            picked = picked + jnp.where(tgt == k, xs[k], 0.0)
            if need_sum_x:
                sum_x = sum_x + xs[k]
    else:
        col = jax.lax.broadcasted_iota(jnp.int32, (tile_rows, c), 1)
        m = jnp.max(x, axis=1, keepdims=True)                       # (tile_rows, 1)
        sumexp = jnp.sum(jnp.exp(x - m), axis=1, keepdims=True)
        picked = jnp.sum(jnp.where(col == tgt, x, 0.0), axis=1, keepdims=True)
        sum_x = jnp.sum(x, axis=1, keepdims=True) if need_sum_x else None

    lse = jnp.log(sumexp)                                           # (tile_rows, g)

    if label_smooth is not None:
        hi = 1.0 - float(label_smooth)
        lo = min(float(label_smooth) / (class_num - 1), hi)  # torch.clamp(min>max)->max
        # loss = -sum(clip(one_hot, lo, hi) * log_softmax(x), axis=1)
        #      = -((hi - lo) * logp[target] + lo * sum_j logp_j)
        logp_t = picked - m - lse
        sum_logp = sum_x - c * (m + lse)
        loss = -((hi - lo) * logp_t + lo * sum_logp)
    else:
        # -pred[target] + log(sum_j exp(pred_j + eps)); exp(x+eps) = e^eps * exp(x)
        eps = 1e-12
        loss = -picked + (m + lse + eps)

    # Mask padded / overhanging entries (original row index >= N).  Keep the
    # select (not a multiply-by-mask) so garbage NaN/Inf never reaches the sum.
    row = jax.lax.broadcasted_iota(jnp.int32, loss.shape, 0)
    slot = jax.lax.broadcasted_iota(jnp.int32, loss.shape, 1)
    orig_row = (i * tile_rows + row) * g + slot
    tile_sum = jnp.sum(jnp.where(orig_row < n_total, loss, 0.0))

    # Per-tile partial sum in a private lane-dense block (reduced in the wrapper).
    out_ref[...] = jnp.full((1, 8, 128), tile_sum, dtype=jnp.float32)


def _vmem_limits():
    """(scoped VMEM limit to request, working-set budget) in bytes."""
    try:
        cap = int(pltpu.get_tpu_info().vmem_capacity_bytes)
    except Exception:
        cap = 64 * 1024 * 1024                     # conservative (v7x per-TC VMEM)
    limit = min(cap // 2, 64 * 1024 * 1024)        # 64 MiB on v5e/v6e, 32 MiB on v7x
    budget = (limit * 3) // 5                      # keep working set <= ~60% of limit
    return limit, budget


def _choose_tile_rows(lanes_logical, itemsize, budget):
    """Packed rows per block, multiple of 8, counting real VMEM-resident cost."""
    lanes = max(128, ((lanes_logical + 127) // 128) * 128)   # lane padding in VMEM
    per_row = (2 * lanes * itemsize    # double-buffered input tile (native dtype)
               + 2 * 128 * 4           # double-buffered int32 target tile (lane-padded)
               + 4 * lanes * 4)        # ~4 full-width f32 temporaries in the body
    t = max(8, budget // per_row)
    return (t // 8) * 8


def smooth_ce_loss(pred, target, *, label_smooth=None, class_num=2, tile_rows=None):
    """pred: [N, C] float (any float dtype), target: [N] int.
    Returns scalar f32 mean loss (matches PyTorch smooth_CELoss.forward)."""
    n, c = pred.shape
    assert c == class_num, "class_num must match pred's last dim"
    tgt = target.astype(jnp.int32)
    itemsize = jnp.dtype(pred.dtype).itemsize

    # Lane-dense class packing: worth it while the per-class slice loop
    # (~C^2/128 vreg passes) beats the unpacked C/128 lane utilization.
    g = (128 // c) if (c * c <= 128) else 1

    if g > 1:
        n_pad = ((n + g - 1) // g) * g
        if n_pad != n:
            pred = jnp.pad(pred, ((0, n_pad - n), (0, 0)))
            tgt = jnp.pad(tgt, ((0, n_pad - n),))
        n_groups = n_pad // g
        # packed[i, k*g + r] = pred[i*g + r, k]  (class-major within a packed row)
        pred_p = jnp.transpose(pred.reshape(n_groups, g, c), (0, 2, 1))
        pred_p = pred_p.reshape(n_groups, c * g)
        tgt_p = tgt.reshape(n_groups, g)
        lanes_logical = c * g
    else:
        n_groups = n
        pred_p = pred
        tgt_p = tgt.reshape(n, 1)
        lanes_logical = c

    # Pad packed rows to a multiple of 8 sublanes (cheap; masked in-kernel).
    n_groups_pad = ((n_groups + 7) // 8) * 8
    if n_groups_pad != n_groups:
        pred_p = jnp.pad(pred_p, ((0, n_groups_pad - n_groups), (0, 0)))
        tgt_p = jnp.pad(tgt_p, ((0, n_groups_pad - n_groups), (0, 0)))

    vmem_limit, budget = _vmem_limits()
    if tile_rows is None:
        tile_rows = _choose_tile_rows(lanes_logical, itemsize, budget)
    tile_rows = max(8, min((tile_rows // 8) * 8, n_groups_pad))
    grid_n = pl.cdiv(n_groups_pad, tile_rows)

    kernel = functools.partial(
        _smooth_ce_kernel, label_smooth=label_smooth, class_num=class_num,
        g=g, n_total=n, tile_rows=tile_rows)

    cost = pl.CostEstimate(
        flops=8 * n * c,
        transcendentals=n * c + n,
        bytes_accessed=n * c * itemsize + n * 4 + grid_n * 8 * 128 * 4)

    partials = pl.pallas_call(
        kernel,
        out_shape=jax.ShapeDtypeStruct((grid_n, 8, 128), jnp.float32),
        grid=(grid_n,),
        in_specs=[
            pl.BlockSpec((tile_rows, lanes_logical), lambda i: (i, 0)),  # packed pred
            pl.BlockSpec((tile_rows, g), lambda i: (i, 0)),              # packed targets
        ],
        out_specs=pl.BlockSpec((1, 8, 128), lambda i: (i, 0, 0)),
        compiler_params=pltpu.CompilerParams(
            dimension_semantics=("parallel",),
            vmem_limit_bytes=vmem_limit),
        cost_estimate=cost,
    )(pred_p, tgt_p)

    return jnp.sum(partials[:, 0, 0]) / n


def _reference(pred, target, label_smooth, class_num):
    """Pure-JAX replica of the PyTorch forward, for correctness checks."""
    pred = pred.astype(jnp.float32)
    eps = 1e-12
    if label_smooth is not None:
        logprobs = jax.nn.log_softmax(pred, axis=1)
        oh = jax.nn.one_hot(target, class_num, dtype=jnp.float32)
        oh = jnp.clip(oh, label_smooth / (class_num - 1), 1.0 - label_smooth)
        loss = -jnp.sum(oh * logprobs, axis=1)
    else:
        picked = jnp.take_along_axis(pred, target[:, None], axis=1)[:, 0]
        loss = -picked + jnp.log(jnp.sum(jnp.exp(pred + eps), axis=1))
    return jnp.mean(loss)


if __name__ == "__main__":
    key = jax.random.PRNGKey(0)
    k1, k2, k3, k4, k5, k6 = jax.random.split(key, 6)

    # --- small sanity: N=8, C=4 (packed path g=32, heavy row padding) --------
    N, C = 8, 4
    pred = jax.random.normal(k1, (N, C), dtype=jnp.float32)
    target = jax.random.randint(k2, (N,), 0, C, dtype=jnp.int32)

    out_s = jax.block_until_ready(smooth_ce_loss(pred, target, label_smooth=0.1, class_num=C))
    ref_s = _reference(pred, target, 0.1, C)
    assert jnp.allclose(out_s, ref_s, atol=1e-5, rtol=1e-5), (out_s, ref_s)

    out_p = jax.block_until_ready(smooth_ce_loss(pred, target, label_smooth=None, class_num=C))
    ref_p = _reference(pred, target, None, C)
    assert jnp.allclose(out_p, ref_p, atol=1e-5, rtol=1e-5), (out_p, ref_p)

    # --- multi-tile grid + ragged rows + native bf16 input (packed path) -----
    N2 = 300
    pred2 = jax.random.normal(k3, (N2, C), dtype=jnp.float32).astype(jnp.bfloat16)
    target2 = jax.random.randint(k4, (N2,), 0, C, dtype=jnp.int32)

    out_t = jax.block_until_ready(
        smooth_ce_loss(pred2, target2, label_smooth=0.1, class_num=C, tile_rows=8))
    ref_t = _reference(pred2, target2, 0.1, C)
    assert jnp.allclose(out_t, ref_t, atol=1e-4, rtol=1e-4), (out_t, ref_t)

    out_tp = jax.block_until_ready(
        smooth_ce_loss(pred2, target2, label_smooth=None, class_num=C, tile_rows=8))
    ref_tp = _reference(pred2, target2, None, C)
    assert jnp.allclose(out_tp, ref_tp, atol=1e-4, rtol=1e-4), (out_tp, ref_tp)

    # --- larger class count (non-packed path, axis reductions) ---------------
    N3, C3 = 24, 96
    pred3 = jax.random.normal(k5, (N3, C3), dtype=jnp.float32)
    target3 = jax.random.randint(k6, (N3,), 0, C3, dtype=jnp.int32)

    out_w = jax.block_until_ready(
        smooth_ce_loss(pred3, target3, label_smooth=0.05, class_num=C3))
    ref_w = _reference(pred3, target3, 0.05, C3)
    assert jnp.allclose(out_w, ref_w, atol=1e-5, rtol=1e-5), (out_w, ref_w)

    out_wp = jax.block_until_ready(
        smooth_ce_loss(pred3, target3, label_smooth=None, class_num=C3))
    ref_wp = _reference(pred3, target3, None, C3)
    assert jnp.allclose(out_wp, ref_wp, atol=1e-5, rtol=1e-5), (out_wp, ref_wp)

    print("KERNEL_OK")
</pallas_src>

<mosaic_0001>
module attributes {stable_mosaic.version = 11 : i64} {
  func.func @_smooth_ce_kernel(%arg0: i32, %arg1: memref<8x128xf32, #tpu.memory_space<vmem>>, %arg2: memref<8x32xi32, #tpu.memory_space<vmem>>, %arg3: memref<1x8x128xf32, #tpu.memory_space<vmem>>) attributes {dimension_semantics = [#tpu.dimension_semantics<parallel>], iteration_bounds = array<i64: 1>, scalar_prefetch = 0 : i64, scratch_operands = 0 : i64, tpu.core_type = #tpu.core_type<tc>, window_params = [{transform_indices = @transform_0, window_bounds = array<i64: 8, 128>}, {transform_indices = @transform_1, window_bounds = array<i64: 8, 32>}, {transform_indices = @transform_2, window_bounds = array<i64: 1, 8, 128>}]} {
    %c0 = arith.constant 0 : index
    %c0_0 = arith.constant 0 : index
    %0 = vector.load %arg1[%c0, %c0_0] : memref<8x128xf32, #tpu.memory_space<vmem>>, vector<8x128xf32>
    %c0_1 = arith.constant 0 : index
    %c0_2 = arith.constant 0 : index
    %1 = vector.load %arg2[%c0_1, %c0_2] : memref<8x32xi32, #tpu.memory_space<vmem>>, vector<8x32xi32>
    %2 = vector.extract_strided_slice %0 {offsets = [0, 0], sizes = [8, 32], strides = [1, 1]} : vector<8x128xf32> to vector<8x32xf32>
    %3 = vector.extract_strided_slice %0 {offsets = [0, 32], sizes = [8, 32], strides = [1, 1]} : vector<8x128xf32> to vector<8x32xf32>
    %4 = vector.extract_strided_slice %0 {offsets = [0, 64], sizes = [8, 32], strides = [1, 1]} : vector<8x128xf32> to vector<8x32xf32>
    %5 = vector.extract_strided_slice %0 {offsets = [0, 96], sizes = [8, 32], strides = [1, 1]} : vector<8x128xf32> to vector<8x32xf32>
    %6 = arith.maximumf %2, %3 : vector<8x32xf32>
    %7 = arith.maximumf %6, %4 : vector<8x32xf32>
    %8 = arith.maximumf %7, %5 : vector<8x32xf32>
    %cst = arith.constant 0.000000e+00 : f32
    %9 = vector.broadcast %cst : f32 to vector<8x32xf32>
    %cst_3 = arith.constant 0.000000e+00 : f32
    %10 = vector.broadcast %cst_3 : f32 to vector<8x32xf32>
    %cst_4 = arith.constant 0.000000e+00 : f32
    %11 = vector.broadcast %cst_4 : f32 to vector<8x32xf32>
    %12 = arith.subf %2, %8 : vector<8x32xf32>
    %13 = math.exp %12 : vector<8x32xf32>
    %14 = arith.addf %9, %13 : vector<8x32xf32>
    %c0_i32 = arith.constant 0 : i32
    %15 = vector.broadcast %c0_i32 : i32 to vector<8x32xi32>
    %16 = arith.cmpi eq, %1, %15 : vector<8x32xi32>
    %cst_5 = arith.constant 0.000000e+00 : f32
    %17 = vector.broadcast %cst_5 : f32 to vector<8x32xf32>
    %18 = arith.select %16, %2, %17 : vector<8x32xi1>, vector<8x32xf32>
    %19 = arith.addf %10, %18 : vector<8x32xf32>
    %20 = arith.addf %11, %2 : vector<8x32xf32>
    %21 = arith.subf %3, %8 : vector<8x32xf32>
    %22 = math.exp %21 : vector<8x32xf32>
    %23 = arith.addf %14, %22 : vector<8x32xf32>
    %c1_i32 = arith.constant 1 : i32
    %24 = vector.broadcast %c1_i32 : i32 to vector<8x32xi32>
    %25 = arith.cmpi eq, %1, %24 : vector<8x32xi32>
    %cst_6 = arith.constant 0.000000e+00 : f32
    %26 = vector.broadcast %cst_6 : f32 to vector<8x32xf32>
    %27 = arith.select %25, %3, %26 : vector<8x32xi1>, vector<8x32xf32>
    %28 = arith.addf %19, %27 : vector<8x32xf32>
    %29 = arith.addf %20, %3 : vector<8x32xf32>
    %30 = arith.subf %4, %8 : vector<8x32xf32>
    %31 = math.exp %30 : vector<8x32xf32>
    %32 = arith.addf %23, %31 : vector<8x32xf32>
    %c2_i32 = arith.constant 2 : i32
    %33 = vector.broadcast %c2_i32 : i32 to vector<8x32xi32>
    %34 = arith.cmpi eq, %1, %33 : vector<8x32xi32>
    %cst_7 = arith.constant 0.000000e+00 : f32
    %35 = vector.broadcast %cst_7 : f32 to vector<8x32xf32>
    %36 = arith.select %34, %4, %35 : vector<8x32xi1>, vector<8x32xf32>
    %37 = arith.addf %28, %36 : vector<8x32xf32>
    %38 = arith.addf %29, %4 : vector<8x32xf32>
    %39 = arith.subf %5, %8 : vector<8x32xf32>
    %40 = math.exp %39 : vector<8x32xf32>
    %41 = arith.addf %32, %40 : vector<8x32xf32>
    %c3_i32 = arith.constant 3 : i32
    %42 = vector.broadcast %c3_i32 : i32 to vector<8x32xi32>
    %43 = arith.cmpi eq, %1, %42 : vector<8x32xi32>
    %cst_8 = arith.constant 0.000000e+00 : f32
    %44 = vector.broadcast %cst_8 : f32 to vector<8x32xf32>
    %45 = arith.select %43, %5, %44 : vector<8x32xi1>, vector<8x32xf32>
    %46 = arith.addf %37, %45 : vector<8x32xf32>
    %47 = arith.addf %38, %5 : vector<8x32xf32>
    %48 = math.log %41 : vector<8x32xf32>
    %49 = arith.subf %46, %8 : vector<8x32xf32>
    %50 = arith.subf %49, %48 : vector<8x32xf32>
    %51 = arith.addf %8, %48 : vector<8x32xf32>
    %cst_9 = arith.constant 4.000000e+00 : f32
    %52 = vector.broadcast %cst_9 : f32 to vector<8x32xf32>
    %53 = arith.mulf %52, %51 : vector<8x32xf32>
    %54 = arith.subf %47, %53 : vector<8x32xf32>
    %cst_10 = arith.constant 0.866666674 : f32
    %55 = vector.broadcast %cst_10 : f32 to vector<8x32xf32>
    %56 = arith.mulf %55, %50 : vector<8x32xf32>
    %cst_11 = arith.constant 0.0333333351 : f32
    %57 = vector.broadcast %cst_11 : f32 to vector<8x32xf32>
    %58 = arith.mulf %57, %54 : vector<8x32xf32>
    %59 = arith.addf %56, %58 : vector<8x32xf32>
    %cst_12 = arith.constant 0.000000e+00 : f32
    %60 = vector.broadcast %cst_12 : f32 to vector<8x32xf32>
    %61 = arith.subf %60, %59 : vector<8x32xf32>
    %62 = tpu.iota {dimensions = array<i32: 0>} : vector<8x32xi32>
    %63 = tpu.iota {dimensions = array<i32: 1>} : vector<8x32xi32>
    %c8_i32 = arith.constant 8 : i32
    %64 = arith.muli %arg0, %c8_i32 : i32
    %65 = vector.broadcast %64 : i32 to vector<8x32xi32>
    %66 = arith.addi %65, %62 : vector<8x32xi32>
    %c32_i32 = arith.constant 32 : i32
    %67 = vector.broadcast %c32_i32 : i32 to vector<8x32xi32>
    %68 = arith.muli %66, %67 : vector<8x32xi32>
    %69 = arith.addi %68, %63 : vector<8x32xi32>
    %c8_i32_13 = arith.constant 8 : i32
    %70 = vector.broadcast %c8_i32_13 : i32 to vector<8x32xi32>
    %71 = arith.cmpi slt, %69, %70 : vector<8x32xi32>
    %cst_14 = arith.constant 0.000000e+00 : f32
    %72 = vector.broadcast %cst_14 : f32 to vector<8x32xf32>
    %73 = arith.select %71, %61, %72 : vector<8x32xi1>, vector<8x32xf32>
    %74 = vector.shape_cast %73 : vector<8x32xf32> to vector<1x8x32xf32>
    %cst_15 = arith.constant dense<0.000000e+00> : vector<1xf32>
    %75 = vector.multi_reduction <add>, %74, %cst_15 [1, 2] : vector<1x8x32xf32> to vector<1xf32>
    %76 = vector.shape_cast %75 : vector<1xf32> to vector<1x1x1xf32>
    %77 = vector.extract %76[0, 0, 0] : f32 from vector<1x1x1xf32>
    %78 = vector.broadcast %77 : f32 to vector<1x8x128xf32>
    %c0_16 = arith.constant 0 : index
    %c0_17 = arith.constant 0 : index
    %c0_18 = arith.constant 0 : index
    %79 = vector.load %arg3[%c0_16, %c0_17, %c0_18] : memref<1x8x128xf32, #tpu.memory_space<vmem>>, vector<1x8x128xf32>
    tpu.vector_store %arg3[%c0_16, %c0_17, %c0_18], %78 {strides = array<i32>} : memref<1x8x128xf32, #tpu.memory_space<vmem>>, vector<1x8x128xf32>,
    return
  }
  func.func @transform_0(%arg0: i32) -> (i32, i32) {
    %c0_i32 = arith.constant 0 : i32
    %c0_i32_0 = arith.constant 0 : i32
    return %arg0, %c0_i32 : i32, i32
  }
  func.func @transform_1(%arg0: i32) -> (i32, i32) {
    %c0_i32 = arith.constant 0 : i32
    %c0_i32_0 = arith.constant 0 : i32
    return %arg0, %c0_i32 : i32, i32
  }
  func.func @transform_2(%arg0: i32) -> (i32, i32, i32) {
    %c0_i32 = arith.constant 0 : i32
    %c0_i32_0 = arith.constant 0 : i32
    %c0_i32_1 = arith.constant 0 : i32
    return %arg0, %c0_i32, %c0_i32_0 : i32, i32, i32
  }
}

</mosaic_0001>

<bundles_post_ra>
// kernel: tpu_custom_call.1
= control target key start
LH: loop header
LB: loop body
LE: loop exit
PB: predicated region body
PF: predicated region fallthrough
CT: control target
= control target key end

     0   :  { %7 = vsyncpa [#allocation3], 0  ;;  %s306_s0 = inlined_call_operand.hbm [shape: f32[8,128], index: 0, kind: input, shape index: {}]   ;;  %s307_s1 = inlined_call_operand.hbm [shape: s32[8,32], index: 1, kind: input, shape index: {}]   ;;  %s308_s2 = inlined_call_operand.hbm [shape: f32[1,8,128], index: 2, kind: output, shape index: {}]  }
   0x1   :  { %8 = vsyncpa [#allocation6], 0 }
   0x2   :  { %9 = vsyncpa [#allocation4], 0  ;;  %s246_s9 = smov [#allocation2]   ;;  %s247_s11 = smov [#allocation5]  }
   0x3   :  { %s16_s10 = sshll.u32 %s246_s9, 4  ;;  %s26_s12 = sshll.u32 %s247_s11, 4  ;;  %s17_s10 = int_to_ptr.vmem [resolvable:$true] %s16_s10  ;;  %s27_s12 = int_to_ptr.vmem [resolvable:$true] %s26_s12 }
   0x4   :  { %s174_s15 = scalar_lea.hbm %s306_s0, 128 }
   0x5   :  { %p175_p0 = scmp.ne.s32.totalorder %s306_s0, %s174_s15  ;;  %p178_p1 = scmp.lt.u32.totalorder %s174_s15, %s306_s0 }
   0x7   :  { %p180_p2 = pnand %p178_p1, %p175_p0 }
   0x9   :  { %183 = shalt.err (!%p180_p2)
}
   0xa   :  { %s184_s20 = scalar_lea.vmem %s17_s10, 128  ;;  %p189_p4 = scmp.lt.s32.totalorder %s17_s10, %s17_s10 }
   0xb   :  { %p185_p3 = scmp.ne.s32.totalorder %s17_s10, %s184_s20  ;;  %p190_p5 = scmp.lt.s32.totalorder %s184_s20, %s184_s20 }
   0xd   :  { %p191_p6 = por %p190_p5, %p189_p4 }
   0xf   :  { %p192_p7 = pnand %p191_p6, %p185_p3 }
  0x11   :  { %195 = shalt.err (!%p192_p7)
}
  0x12   :  { %19 = dma.hbm_to_vmem [thread:$0]  %s306_s0, 128, %s17_s10, [#allocation3]  }
  0x13   :  { %s196_s25 = scalar_lea.hbm %s307_s1, 128 }
  0x14   :  { %p197_p8 = scmp.ne.s32.totalorder %s307_s1, %s196_s25  ;;  %p200_p9 = scmp.lt.u32.totalorder %s196_s25, %s307_s1 }
  0x16   :  { %p202_p10 = pnand %p200_p9, %p197_p8 }
  0x18   :  { %205 = shalt.err (!%p202_p10)
}
  0x19   :  { %s206_s30 = scalar_lea.vmem %s27_s12, 128  ;;  %p211_p12 = scmp.lt.s32.totalorder %s27_s12, %s27_s12 }
  0x1a   :  { %p207_p11 = scmp.ne.s32.totalorder %s27_s12, %s206_s30  ;;  %p212_p13 = scmp.lt.s32.totalorder %s206_s30, %s206_s30 }
  0x1c   :  { %p213_p0 = por %p212_p13, %p211_p12 }
  0x1e   :  { %p214_p1 = pnand %p213_p0, %p207_p11 }
  0x20   :  { %217 = shalt.err (!%p214_p1)
}
  0x21   :  { %29 = dma.hbm_to_vmem [thread:$0]  %s307_s1, 128, %s27_s12, [#allocation6]  }
  0x22   :  { %240 = dma.done.wait [#allocation3], 128  }
  0x23   :  { %241 = vsyncadd [#allocation3], 4294967168 }
  0x24   :  { %242 = dma.done.wait [#allocation6], 128  }
  0x25   :  { %243 = vsyncadd [#allocation6], 4294967168  ;;  %v36_v0 = vld [vmem:[#allocation2] sm:$0xff]  ;;  %s248_s4 = smov 96   ;;  %s249_s5 = smov 32   ;;  %v37_v23 = vld [vmem:[#allocation5] sm:$0xff]  ;;  %v116_v35 = vlaneseq }
  0x26   :  { %39 = vrot.lane.b32.xlu0 %v36_v0, %s248_s4  ;;  %47 = vrot.lane.b32.xlu1 %v36_v0, %s249_s5  ;;  %s250_s6 = smov 64   ;;  %vm55_vm0 = vcmp.eq.s32.totalorder %v37_v23, 0  ;;  %vm71_vm1 = vcmp.eq.s32.totalorder %v37_v23, 1  ;;  %vm86_vm2 = vcmp.eq.s32.totalorder %v37_v23, 2  ;;  %vm101_vm3 = vcmp.eq.s32.totalorder %v37_v23, 3  ;;  %s251_s1 = smov [#allocation7]  }
  0x27   :  { %v56_v29 = vsel %vm55_vm0, %v36_v0, 0.0  ;;  %v117_v39 = vshrl.u32 %v116_v35, 7  ;;  %v119_v44 = vand.u32 127, %v116_v35  ;;  %vm127_vm5 = vcmask 261120   ;;  %s146_s7 = sshll.u32 %s251_s1, 4  ;;  %s147_s7 = int_to_ptr.vmem [resolvable:$true] %s146_s7 }
  0x28   :  { %s218_s9 = scalar_lea.vmem %s147_s7, 128  ;;  %p223_p3 = scmp.lt.s32.totalorder %s147_s7, %s147_s7 }
  0x29   :  { %v123_v45 = vmul.u32 32, %v117_v39  ;;  %p219_p2 = scmp.ne.s32.totalorder %s147_s7, %s218_s9  ;;  %p224_p4 = scmp.lt.s32.totalorder %s218_s9, %s218_s9 }
  0x2a   :  { %43 = vrot.lane.b32.xlu0 %v36_v0, %s250_s6 }
  0x2b   :  { %v124_v50 = vadd.s32 %v123_v45, %v119_v44  ;;  %p225_p5 = por %p224_p4, %p223_p3 }
  0x2d   :  { %vm125_vm4 = vcmp.lt.s32.totalorder %v124_v50, 8  ;;  %p226_p6 = pnand %p225_p5, %p219_p2 }
  0x98   :  { %v40_v1 = vpop.permute.xlu0 %39  ;;  %v48_v4 = vpop.permute.xlu1 %47 }
  0x99   :  { %v42_v2 = vmax.f32 %v36_v0, %v40_v1  ;;  %v72_v30 = vsel %vm71_vm1, %v40_v1, 0.0  ;;  %v102_v34 = vsel %vm101_vm3, %v48_v4, 0.0  ;;  %v74_v36 = vadd.f32 %v40_v1, %v36_v0 }
  0x9a   :  { %v73_v32 = vadd.f32 %v72_v30, %v56_v29 }
  0x9c   :  { %v44_v3 = vpop.permute.xlu0 %43 }
  0x9d   :  { %v46_v5 = vmax.f32 %v42_v2, %v44_v3  ;;  %v87_v31 = vsel %vm86_vm2, %v44_v3, 0.0  ;;  %v89_v40 = vadd.f32 %v74_v36, %v44_v3 }
  0x9e   :  { %v88_v33 = vadd.f32 %v87_v31, %v73_v32 }
  0x9f   :  { %v50_v6 = vmax.f32 %v46_v5, %v48_v4  ;;  %v104_v46 = vadd.f32 %v89_v40, %v48_v4 }
  0xa0   :  { %v103_v37 = vadd.f32 %v102_v34, %v88_v33 }
  0xa1   :  { %75 = vrot.lane.b32.xlu0 %v50_v6, %s250_s6  ;;  %60 = vrot.lane.b32.xlu1 %v50_v6, %s249_s5  ;;  %v51_v19 = vsub.f32 %v36_v0, %v50_v6 }
  0xa2   :  { %v107_v42 = vsub.f32 %v103_v37, %v50_v6 }
  0xa3   :  { %v52_v20 = vmul.f32 1.442695, %v51_v19 }
  0xa5   :  { %90 = vrot.lane.b32.xlu1 %v50_v6, %s248_s4 }
 0x113   :  { %v76_v7 = vpop.permute.xlu0 %75  ;;  %v61_v8 = vpop.permute.xlu1 %60 }
 0x114   :  { %v78_v9 = vsub.f32 %v36_v0, %v76_v7  ;;  %v63_v10 = vsub.f32 %v36_v0, %v61_v8 }
 0x116   :  { %v79_v11 = vmul.f32 1.442695, %v78_v9  ;;  %v64_v12 = vmul.f32 1.442695, %v63_v10 }
 0x117   :  { %v91_v13 = vpop.permute.xlu1 %90 }
 0x118   :  { %164 = vpow2.f32 %v79_v11  ;;  %v93_v14 = vsub.f32 %v36_v0, %v91_v13 }
 0x119   :  { %166 = vpow2.f32 %v64_v12 }
 0x11a   :  { %v94_v15 = vmul.f32 1.442695, %v93_v14 }
 0x11c   :  { %168 = vpow2.f32 %v94_v15 }
 0x11d   :  { %170 = vpow2.f32 %v52_v20 }
 0x122   :  { %v165_v16 = vpop.eup %164 }
 0x123   :  { %v167_v17 = vpop.eup %166  ;;  %82 = vrot.lane.b32.xlu1 %v165_v16, %s250_s6 }
 0x124   :  { %67 = vrot.lane.b32.xlu0 %v167_v17, %s248_s4 }
 0x126   :  { %v169_v18 = vpop.eup %168 }
 0x127   :  { %v171_v21 = vpop.eup %170 }
 0x128   :  { %97 = vrot.lane.b32.xlu0 %v169_v18, %s249_s5 }
 0x195   :  { %v83_v25 = vpop.permute.xlu1 %82 }
 0x196   :  { %v68_v22 = vpop.permute.xlu0 %67 }
 0x197   :  { %v70_v24 = vadd.f32 %v171_v21, %v68_v22 }
 0x199   :  { %v85_v26 = vadd.f32 %v83_v25, %v70_v24 }
 0x19a   :  { %v98_v27 = vpop.permute.xlu0 %97 }
 0x19b   :  { %v100_v28 = vadd.f32 %v98_v27, %v85_v26 }
 0x19d   :  { %172 = vlog2.f32 %v100_v28 }
 0x1a7   :  { %v173_v38 = vpop.eup %172 }
 0x1a8   :  { %v106_v41 = vmul.f32 0.6931472, %v173_v38 }
 0x1aa   :  { %v109_v43 = vadd.f32 %v106_v41, %v50_v6  ;;  %v108_v47 = vsub.f32 %v107_v42, %v106_v41 }
 0x1ac   :  { %v110_v48 = vmul.f32 4.0, %v109_v43  ;;  %v112_v51 = vmul.f32 0.8666667, %v108_v47 }
 0x1ae   :  { %v111_v49 = vsub.f32 %v104_v46, %v110_v48 }
 0x1b0   :  { %v113_v52 = vmul.f32 0.033333335, %v111_v49 }
 0x1b2   :  { %v114_v53 = vadd.f32 %v113_v52, %v112_v51 }
 0x1b4   :  { %v115_v54 = vsub.f32 0.0, %v114_v53 }
 0x1b6   :  { %v126_v55 = vsel %vm125_vm4, %v115_v54, 0.0 }
 0x1b7   :  { %v128_v56 = vsel %vm127_vm5, %v126_v55, 0.0 }
 0x1b8   :  { %129 = vadd.xlane.f32.xlu1 %v128_v56 }
 0x245   :  { %v130_v57 = vpop.xlane.xlu1 %129 }
 0x246   :  { %v131_v58 = vrot.slane %v130_v57, 4 }
 0x248   :  { %v132_v59 = vadd.f32 %v131_v58, %v130_v57 }
 0x24a   :  { %v133_v60 = vrot.slane %v132_v59, 2 }
 0x24c   :  { %v134_v61 = vadd.f32 %v133_v60, %v132_v59 }
 0x24e   :  { %v135_v62 = vrot.slane %v134_v61, 1 }
 0x250   :  { %v136_v63 = vadd.f32 %v135_v62, %v134_v61 }
 0x252   :  { %156 = vpush %v136_v63 }
 0x283   :  { %s157_s8 = spop %156 }
 0x284   :  { %v138_v0 = vstv %s157_s8 }
 0x285   :  { %139 = vst [vmem:[#allocation7] sm:$0xff] %v138_v0 }
 0x286   :  { %229 = shalt.err (!%p226_p6)
}
 0x287   :  { %s230_s12 = scalar_lea.hbm %s308_s2, 128 }
 0x288   :  { %p231_p7 = scmp.ne.s32.totalorder %s308_s2, %s230_s12  ;;  %p234_p8 = scmp.lt.u32.totalorder %s230_s12, %s308_s2 }
 0x28a   :  { %p236_p9 = pnand %p234_p8, %p231_p7 }
 0x28c   :  { %239 = shalt.err (!%p236_p9)
}
 0x28d   :  { %149 = dma.vmem_to_hbm [thread:$0]  %s147_s7, 128, %s308_s2, [#allocation4]  }
 0x28e   :  { %244 = dma.done.wait [#allocation4], 128  }
 0x28f   :  { %245 = vsyncadd [#allocation4], 4294967168 }
 0x290   :  { %153 = vsyncpa [#allocation3], 1 }
 0x291   :  { %154 = vsyncpa [#allocation6], 1 }
 0x292   :  { %155 = vsyncpa [#allocation4], 1 }

</bundles_post_ra>
